<compile_context>
chip_gen: v5e
topology: v5e:2x2
jax: 0.10.0
libtpu: 0.0.40
codegen_flags: <defaults>
</compile_context>

<pallas_src>
import jax
import jax.numpy as jnp
from jax.experimental import pallas as pl
from jax.experimental.pallas import tpu as pltpu


def _pu_loss_kernel(recon_ref, target_ref, w_ref, out_ref):
    # Weighted squared error, reduced over the sublane (row) axis only; the
    # cross-tile / cross-lane reduction is a tiny wrapper-side sum.
    diff = recon_ref[...].astype(jnp.float32) - target_ref[...].astype(jnp.float32)
    out_ref[...] = jnp.sum(w_ref[...] * (diff * diff), axis=0, keepdims=True)


def _pick_tile_rows(M, N):
    """Largest row tile that fits a conservative per-chip VMEM budget."""
    try:
        vmem_cap = pltpu.get_tpu_info().vmem_capacity_bytes
    except Exception:
        vmem_cap = 64 * 1024 * 1024  # conservative (v7x-sized) fallback
    # Leave headroom: v7x has 64 MiB physical, v5e/v6e 128 MiB.
    budget = min(vmem_cap // 3, 32 * 1024 * 1024)
    # 3 f32 input streams, double-buffered by the BlockSpec pipeline.
    tm = budget // (3 * 2 * N * 4)
    tm = max(8, min(tm, 2048))
    tm = (tm // 8) * 8                      # sublane multiple
    m_pad8 = ((M + 7) // 8) * 8
    tm = max(8, min(tm, m_pad8))
    return tm, budget


def cda_pu_loss(recon, target, pos_x, pos_y, neg_x, neg_y, alpha):
    """Pallas implementation of CDA_PU_loss.forward."""
    M, N = recon.shape
    alpha = jnp.float32(alpha)

    # Merged, pre-scaled f32 weight matrix (keeps full f32 precision; bf16
    # pre-scaling would break tolerance).
    w = jnp.zeros((M, N), jnp.float32)
    w = w.at[pos_x, pos_y].add((1.0 - alpha) * 0.5)
    w = w.at[neg_x, neg_y].add(alpha * 0.5)

    tm, vmem_budget = _pick_tile_rows(M, N)
    num_tiles = pl.cdiv(M, tm)
    M_pad = num_tiles * tm
    if M_pad != M:
        pad = ((0, M_pad - M), (0, 0))
        recon = jnp.pad(recon, pad)
        target = jnp.pad(target, pad)
        w = jnp.pad(w, pad)                 # zero weight => padded rows add 0

    mat_spec = pl.BlockSpec((tm, N), lambda i: (i, 0))
    bytes_accessed = 3 * M_pad * N * 4 + num_tiles * N * 4

    partials = pl.pallas_call(
        _pu_loss_kernel,
        out_shape=jax.ShapeDtypeStruct((num_tiles, N), jnp.float32),
        grid=(num_tiles,),
        in_specs=[mat_spec, mat_spec, mat_spec],          # recon, target, w
        out_specs=pl.BlockSpec((1, N), lambda i: (i, 0)),  # per-tile partials
        compiler_params=pltpu.CompilerParams(
            dimension_semantics=("parallel",),
            vmem_limit_bytes=int(vmem_budget + (4 << 20)),
        ),
        cost_estimate=pl.CostEstimate(
            flops=4 * M_pad * N,
            transcendentals=0,
            bytes_accessed=bytes_accessed,
        ),
    )(recon, target, w)
    return jnp.sum(partials)


if __name__ == "__main__":
    key = jax.random.PRNGKey(0)
    M, N = 16, 256          # small association matrix (rows x cols)
    n_pos, n_neg = 24, 40   # number of positive / negative index pairs

    k1, k2, k3, k4, k5, k6 = jax.random.split(key, 6)
    CDA_ass_reconstruct = jax.random.normal(k1, (M, N), jnp.float32)
    CD_asso_train = jax.random.bernoulli(k2, 0.3, (M, N)).astype(jnp.float32)
    pos_x_index = jax.random.randint(k3, (n_pos,), 0, M)
    pos_y_index = jax.random.randint(k4, (n_pos,), 0, N)
    neg_x_index = jax.random.randint(k5, (n_neg,), 0, M)
    neg_y_index = jax.random.randint(k6, (n_neg,), 0, N)
    alpha = 0.7

    loss = cda_pu_loss(CDA_ass_reconstruct, CD_asso_train,
                       pos_x_index, pos_y_index,
                       neg_x_index, neg_y_index, alpha)
    loss = jax.block_until_ready(loss)

    # Pure-JAX reference (mirrors the PyTorch forward exactly).
    loss_mat = (CDA_ass_reconstruct - CD_asso_train) ** 2
    ref = (loss_mat[pos_x_index, pos_y_index].sum() * ((1.0 - alpha) / 2.0)
           + loss_mat[neg_x_index, neg_y_index].sum() * (alpha / 2.0))
    assert jnp.allclose(loss, ref, rtol=1e-5, atol=1e-5), (loss, ref)

    print("KERNEL_OK")
</pallas_src>

<mosaic_0001>
module attributes {stable_mosaic.version = 11 : i64} {
  func.func @_pu_loss_kernel(%arg0: i32, %arg1: memref<16x256xf32, #tpu.memory_space<vmem>>, %arg2: memref<16x256xf32, #tpu.memory_space<vmem>>, %arg3: memref<16x256xf32, #tpu.memory_space<vmem>>, %arg4: memref<1x256xf32, #tpu.memory_space<vmem>>) attributes {dimension_semantics = [#tpu.dimension_semantics<parallel>], iteration_bounds = array<i64: 1>, scalar_prefetch = 0 : i64, scratch_operands = 0 : i64, tpu.core_type = #tpu.core_type<tc>, window_params = [{transform_indices = @transform_0, window_bounds = array<i64: 16, 256>}, {transform_indices = @transform_1, window_bounds = array<i64: 16, 256>}, {transform_indices = @transform_2, window_bounds = array<i64: 16, 256>}, {transform_indices = @transform_3, window_bounds = array<i64: 1, 256>}]} {
    %c0 = arith.constant 0 : index
    %c0_0 = arith.constant 0 : index
    %0 = vector.load %arg1[%c0, %c0_0] : memref<16x256xf32, #tpu.memory_space<vmem>>, vector<16x256xf32>
    %c0_1 = arith.constant 0 : index
    %c0_2 = arith.constant 0 : index
    %1 = vector.load %arg2[%c0_1, %c0_2] : memref<16x256xf32, #tpu.memory_space<vmem>>, vector<16x256xf32>
    %2 = arith.subf %0, %1 : vector<16x256xf32>
    %c0_3 = arith.constant 0 : index
    %c0_4 = arith.constant 0 : index
    %3 = vector.load %arg3[%c0_3, %c0_4] : memref<16x256xf32, #tpu.memory_space<vmem>>, vector<16x256xf32>
    %4 = arith.mulf %2, %2 : vector<16x256xf32>
    %5 = arith.mulf %3, %4 : vector<16x256xf32>
    %cst = arith.constant dense<0.000000e+00> : vector<256xf32>
    %6 = vector.multi_reduction <add>, %5, %cst [0] : vector<16x256xf32> to vector<256xf32>
    %7 = vector.shape_cast %6 : vector<256xf32> to vector<1x256xf32>
    %c0_5 = arith.constant 0 : index
    %c0_6 = arith.constant 0 : index
    %8 = vector.load %arg4[%c0_5, %c0_6] : memref<1x256xf32, #tpu.memory_space<vmem>>, vector<1x256xf32>
    tpu.vector_store %arg4[%c0_5, %c0_6], %7 {strides = array<i32>} : memref<1x256xf32, #tpu.memory_space<vmem>>, vector<1x256xf32>,
    return
  }
  func.func @transform_0(%arg0: i32) -> (i32, i32) {
    %c0_i32 = arith.constant 0 : i32
    %c0_i32_0 = arith.constant 0 : i32
    return %arg0, %c0_i32 : i32, i32
  }
  func.func @transform_1(%arg0: i32) -> (i32, i32) {
    %c0_i32 = arith.constant 0 : i32
    %c0_i32_0 = arith.constant 0 : i32
    return %arg0, %c0_i32 : i32, i32
  }
  func.func @transform_2(%arg0: i32) -> (i32, i32) {
    %c0_i32 = arith.constant 0 : i32
    %c0_i32_0 = arith.constant 0 : i32
    return %arg0, %c0_i32 : i32, i32
  }
  func.func @transform_3(%arg0: i32) -> (i32, i32) {
    %c0_i32 = arith.constant 0 : i32
    %c0_i32_0 = arith.constant 0 : i32
    return %arg0, %c0_i32 : i32, i32
  }
}

</mosaic_0001>

<bundles_post_ra>
// kernel: tpu_custom_call.1
= control target key start
LH: loop header
LB: loop body
LE: loop exit
PB: predicated region body
PF: predicated region fallthrough
CT: control target
= control target key end

     0   :  { %8 = vsyncpa [#allocation3], 0  ;;  %s275_s0 = inlined_call_operand.hbm [shape: f32[16,256], index: 0, kind: input, shape index: {}]   ;;  %s276_s1 = inlined_call_operand.hbm [shape: f32[16,256], index: 1, kind: input, shape index: {}]   ;;  %s277_s2 = inlined_call_operand.hbm [shape: f32[16,256], index: 2, kind: input, shape index: {}]   ;;  %s278_s3 = inlined_call_operand.hbm [shape: f32[1,256], index: 3, kind: output, shape index: {}]  }
   0x1   :  { %9 = vsyncpa [#allocation6], 0 }
   0x2   :  { %10 = vsyncpa [#allocation4], 0  ;;  %s28_s14 = sshll.u32 %s276_s1, 4  ;;  %s237_s15 = smov [#allocation5]   ;;  %s29_s14 = int_to_ptr.hbm [resolvable:$true] %s28_s14 }
   0x3   :  { %s30_s16 = sshll.u32 %s237_s15, 4  ;;  %s15_s19 = sshll.u32 %s275_s0, 4  ;;  %s31_s16 = int_to_ptr.vmem [resolvable:$true] %s30_s16  ;;  %s16_s19 = int_to_ptr.hbm [resolvable:$true] %s15_s19 }
   0x4   :  { %s238_s20 = smov 256   ;;  %s239_s21 = smov 16  }
   0x5   :  { %36 = dma.hbm_to_vmem [thread:$0]  %s29_s14, 512, %s31_s16, [#allocation6], %s238_s20, %s238_s20, %s239_s21  }
   0x6   :  { %s240_s22 = smov [#allocation2]   ;;  %s41_s26 = sshll.u32 %s277_s2, 4  ;;  %s42_s26 = int_to_ptr.hbm [resolvable:$true] %s41_s26 }
   0x7   :  { %s17_s23 = sshll.u32 %s240_s22, 4  ;;  %s241_s1 = smov [#allocation7]   ;;  %s18_s23 = int_to_ptr.vmem [resolvable:$true] %s17_s23 }
   0x8   :  { %23 = dma.hbm_to_vmem [thread:$0]  %s16_s19, 512, %s18_s23, [#allocation3], %s238_s20, %s238_s20, %s239_s21  }
   0x9   :  { %s43_s27 = sshll.u32 %s241_s1, 4  ;;  %s44_s27 = int_to_ptr.vmem [resolvable:$true] %s43_s27 }
   0xa   :  { %49 = dma.hbm_to_vmem [thread:$0]  %s42_s26, 512, %s44_s27, [#allocation6], %s238_s20, %s238_s20, %s239_s21  }
   0xb   :  { %231 = dma.done.wait [#allocation3], 512  }
   0xc   :  { %232 = vsyncadd [#allocation3], 4294966784 }
   0xd   :  { %233 = dma.done.wait [#allocation6], 1024  }
   0xe   :  { %234 = vsyncadd [#allocation6], 4294966272  ;;  %v62_v0 = vld [vmem:[#allocation2] sm:$0xff]  ;;  %v63_v1 = vld [vmem:[#allocation2 + $0x8] sm:$0xff]  ;;  %v106_v36 = vlaneseq  ;;  %s242_s0 = smov [#allocation8]   ;;  %s118_s30 = sshll.u32 %s278_s3, 4  ;;  %s119_s30 = int_to_ptr.hbm [resolvable:$true] %s118_s30 }
   0xf   :  { %v64_v2 = vld [vmem:[#allocation2 + $0x10] sm:$0xff]  ;;  %v65_v3 = vld [vmem:[#allocation2 + $0x18] sm:$0xff]  ;;  %v66_v4 = vld [vmem:[#allocation5] sm:$0xff]  ;;  %s116_s2 = sshll.u32 %s242_s0, 4  ;;  %vm103_vm0 = vcmask 1040384   ;;  %s117_s2 = int_to_ptr.vmem [resolvable:$true] %s116_s2 }
  0x10   :  { %v67_v5 = vld [vmem:[#allocation5 + $0x8] sm:$0xff]  ;;  %v68_v6 = vld [vmem:[#allocation5 + $0x10] sm:$0xff]  ;;  %v69_v7 = vld [vmem:[#allocation5 + $0x18] sm:$0xff]  ;;  %v70_v8 = vsub.f32 %v62_v0, %v66_v4  ;;  %vm108_vm1 = vcmp.lt.s32.totalorder %v106_v36, 256 }
  0x11   :  { %v71_v9 = vsub.f32 %v63_v1, %v67_v5  ;;  %v72_v10 = vsub.f32 %v64_v2, %v68_v6  ;;  %v73_v11 = vsub.f32 %v65_v3, %v69_v7  ;;  %v74_v12 = vld [vmem:[#allocation7] sm:$0xff]  ;;  %v75_v13 = vld [vmem:[#allocation7 + $0x8] sm:$0xff]  ;;  %v76_v14 = vld [vmem:[#allocation7 + $0x10] sm:$0xff] }
  0x12   :  { %v77_v15 = vld [vmem:[#allocation7 + $0x18] sm:$0xff]  ;;  %v78_v16 = vmul.f32 %v70_v8, %v70_v8 }
  0x13   :  { %v79_v17 = vmul.f32 %v71_v9, %v71_v9  ;;  %v80_v18 = vmul.f32 %v72_v10, %v72_v10  ;;  %v81_v19 = vmul.f32 %v73_v11, %v73_v11 }
  0x14   :  { %v82_v20 = vmul.f32 %v78_v16, %v74_v12 }
  0x15   :  { %v83_v21 = vmul.f32 %v79_v17, %v75_v13  ;;  %v84_v22 = vmul.f32 %v80_v18, %v76_v14  ;;  %v85_v23 = vmul.f32 %v81_v19, %v77_v15 }
  0x17   :  { %v86_v24 = vadd.f32 %v84_v22, %v82_v20  ;;  %v93_v25 = vadd.f32 %v85_v23, %v83_v21 }
  0x19   :  { %v87_v26 = vrot.slane %v86_v24, 4  ;;  %v94_v27 = vrot.slane %v93_v25, 4 }
  0x1b   :  { %v88_v28 = vadd.f32 %v87_v26, %v86_v24  ;;  %v95_v29 = vadd.f32 %v94_v27, %v93_v25 }
  0x1d   :  { %v89_v30 = vrot.slane %v88_v28, 2  ;;  %v96_v31 = vrot.slane %v95_v29, 2 }
  0x1f   :  { %v90_v32 = vadd.f32 %v89_v30, %v88_v28  ;;  %v97_v33 = vadd.f32 %v96_v31, %v95_v29 }
  0x21   :  { %v91_v34 = vrot.slane %v90_v32, 1  ;;  %v98_v35 = vrot.slane %v97_v33, 1 }
  0x23   :  { %v92_v37 = vadd.f32 %v91_v34, %v90_v32  ;;  %v99_v38 = vadd.f32 %v98_v35, %v97_v33 }
  0x25   :  { %v102_v39 = vrot.slane %v99_v38, 7 }
  0x27   :  { %v104_v40 = vsel %vm103_vm0, %v92_v37, %v102_v39 }
  0x28   :  { %110 = vst.msk [vmem:[#allocation8] sm:$0x3] %vm108_vm1, %v104_v40 }
  0x29   :  { %121 = dma.vmem_to_hbm [thread:$0]  %s117_s2, 32, %s119_s30, [#allocation4]  }
  0x2a   :  { %235 = dma.done.wait [#allocation4], 32  }
  0x2b   :  { %236 = vsyncadd [#allocation4], 4294967264 }
  0x2c   :  { %126 = vsyncpa [#allocation3], 1 }
  0x2d   :  { %127 = vsyncpa [#allocation6], 1 }
  0x2e   :  { %128 = vsyncpa [#allocation4], 1 }

</bundles_post_ra>
